<compile_context>
chip_gen: v5e
topology: v5e:2x2
jax: 0.10.0
libtpu: 0.0.40
codegen_flags: <defaults>
</compile_context>

<pallas_src>
import functools

import jax
import jax.numpy as jnp
from jax.experimental import pallas as pl
from jax.experimental.pallas import tpu as pltpu


def gpn_kernel(x_ref, w_ref, b_ref, spike_ref, vfinal_ref, v_scr):
    """One (batch_tile, time_step) grid point of the GPN rollout.

    x_ref:      (tile_b, C)  f32   input for this time step
    w_ref:      (2C, 3C)     bf16  VMEM-resident Linear weight (torch weight.T)
    b_ref:      (1, 3C)      f32   VMEM-resident Linear bias
    spike_ref:  (tile_b, C)  bf16  spike output for this step
    vfinal_ref: (tile_b, C)  f32   final membrane state (written on last step)
    v_scr:      (tile_b, C)  f32   VMEM scratch carrying v across time steps
    """
    t = pl.program_id(1)

    @pl.when(t == 0)
    def _():
        # eval-mode first-call init: v_reset = 0, v = v_reset
        v_scr[...] = jnp.zeros_like(v_scr)

    v = v_scr[...]                         # (tile_b, C) f32
    x = x_ref[...]                         # (tile_b, C) f32
    C = x.shape[-1]

    # Fused concat-Linear: cat([v, x], -1) @ W + bias.
    # Single K=2C bf16 MXU push with f32 accumulation.
    vx = jnp.concatenate([v, x], axis=-1).astype(jnp.bfloat16)     # (tile_b, 2C)
    out = jnp.dot(vx, w_ref[...], preferred_element_type=jnp.float32) + b_ref[...]

    f = jax.nn.sigmoid(out[:, 0 * C:1 * C])      # forget gate
    b = jnp.tanh(out[:, 1 * C:2 * C])            # bias/update term
    thr = jax.nn.sigmoid(out[:, 2 * C:3 * C])    # firing threshold

    # v_hidden = f*v + (1-f)*x  ==  x + f*(v - x)   (one mul saved)
    v_hidden = x + f * (v - x)

    # surrogate.ATan forward pass is the Heaviside step (surrogate only changes
    # the backward gradient, which this forward kernel does not implement).
    mask = (v_hidden - thr) >= 0.0

    # v_new = (1-spike)*v_hidden + spike*v_reset + b, with v_reset == 0 (eval).
    v_new = jnp.where(mask, 0.0, v_hidden) + b

    v_scr[...] = v_new
    spike_ref[...] = mask.astype(spike_ref.dtype)

    @pl.when(t == pl.num_programs(1) - 1)
    def _():
        vfinal_ref[...] = v_new.astype(vfinal_ref.dtype)


@functools.partial(jax.jit, static_argnames=("tile_b",))
def gpn_forward(x_seq, w, bias, *, tile_b=None):
    """Run T steps of GPN_wo_I (eval mode) over x_seq.

    x_seq: (T, B, C) f32.  w: (2C, 3C) f32 (== torch nn.Linear weight.T).
    bias: (3C,) f32.
    Returns (spike_seq (T, B, C) bf16 in {0,1}, v_final (B, C) f32).
    """
    T, B, C = x_seq.shape
    if tile_b is None:
        # Batch tile: big enough for HBM pipelining at scale, capped so the
        # double-buffered tiles + (tile_b, 3C) intermediates + resident W stay
        # well under v7x's 32 MiB scoped-VMEM default.
        tile_b = min(B, 512)
    assert B % tile_b == 0, "batch must be divisible by the batch tile"

    w_bf16 = w.astype(jnp.bfloat16)                    # halves weight DMA/VMEM
    bias2 = bias.reshape(1, 3 * C).astype(jnp.float32)

    grid = (B // tile_b, T)                            # (parallel, recurrence)

    spike_seq, v_final = pl.pallas_call(
        gpn_kernel,
        grid=grid,
        in_specs=[
            # x_t: new (tile_b, C) slab per (batch, time) point.
            pl.BlockSpec((None, tile_b, C), lambda bi, t: (t, bi, 0)),
            # W / bias: constant index_map -> loaded once, VMEM-resident.
            pl.BlockSpec((2 * C, 3 * C), lambda bi, t: (0, 0)),
            pl.BlockSpec((1, 3 * C), lambda bi, t: (0, 0)),
        ],
        out_specs=(
            # spikes: one (tile_b, C) slab per (batch, time) point.
            pl.BlockSpec((None, tile_b, C), lambda bi, t: (t, bi, 0)),
            # final v: resident across the time axis, flushed per batch tile.
            pl.BlockSpec((tile_b, C), lambda bi, t: (bi, 0)),
        ),
        out_shape=(
            jax.ShapeDtypeStruct((T, B, C), jnp.bfloat16),
            jax.ShapeDtypeStruct((B, C), jnp.float32),
        ),
        scratch_shapes=[pltpu.VMEM((tile_b, C), jnp.float32)],   # carried v
        compiler_params=pltpu.CompilerParams(
            dimension_semantics=("parallel", "arbitrary")),
    )(x_seq, w_bf16, bias2)
    return spike_seq, v_final


def gpn_reference(x_seq, w, bias):
    """Pure-JAX reference of the PyTorch eval-mode forward, stepped T times.

    Mirrors the kernel's compute path (bf16 matmul operands with f32
    accumulation, f32 gating math, select-form of the blend — algebraically
    identical to the module's f*v+(1-f)*x / (1-s)*vh + s*v_reset + b with
    v_reset = 0) so the comparison is apples-to-apples.
    """
    T, B, C = x_seq.shape
    w_bf16 = w.astype(jnp.bfloat16)
    v = jnp.zeros((B, C), jnp.float32)
    spikes = []
    for t in range(T):
        x = x_seq[t]
        vx = jnp.concatenate([v, x], axis=-1).astype(jnp.bfloat16)
        out = jnp.dot(vx, w_bf16, preferred_element_type=jnp.float32) + bias
        f = jax.nn.sigmoid(out[:, :C])
        b = jnp.tanh(out[:, C:2 * C])
        thr = jax.nn.sigmoid(out[:, 2 * C:])
        v_hidden = x + f * (v - x)
        mask = (v_hidden - thr) >= 0.0
        spikes.append(mask.astype(jnp.float32))
        v = jnp.where(mask, 0.0, v_hidden) + b
    return jnp.stack(spikes), v


if __name__ == "__main__":
    # input_channels = 128 (module default); small batch and a short rollout.
    T, B, C = 4, 8, 128

    key = jax.random.PRNGKey(0)
    kx, kw, kb = jax.random.split(key, 3)

    x_seq = jax.random.normal(kx, (T, B, C), dtype=jnp.float32)
    # nn.Linear(2C -> 3C) params, stored transposed as (2C, 3C) == weight.T
    w = 0.05 * jax.random.normal(kw, (2 * C, 3 * C), dtype=jnp.float32)
    bias = 0.05 * jax.random.normal(kb, (3 * C,), dtype=jnp.float32)

    spike_seq, v_final = gpn_forward(x_seq, w, bias)
    jax.block_until_ready((spike_seq, v_final))

    spike_ref, v_ref = gpn_reference(x_seq, w, bias)
    assert spike_seq.shape == (T, B, C) and v_final.shape == (B, C)
    assert jnp.array_equal(spike_seq.astype(jnp.float32), spike_ref), "spike mismatch"
    assert jnp.allclose(v_final, v_ref, atol=5e-3), "v mismatch"

    print("KERNEL_OK")
</pallas_src>

<mosaic_0001>
module attributes {stable_mosaic.version = 11 : i64} {
  func.func @gpn_kernel(%arg0: i32, %arg1: i32, %arg2: memref<1x8x128xf32, #tpu.memory_space<vmem>>, %arg3: memref<256x384xbf16, #tpu.memory_space<vmem>>, %arg4: memref<1x384xf32, #tpu.memory_space<vmem>>, %arg5: memref<1x8x128xbf16, #tpu.memory_space<vmem>>, %arg6: memref<8x128xf32, #tpu.memory_space<vmem>>, %arg7: memref<8x128xf32, #tpu.memory_space<vmem>>) attributes {dimension_semantics = [#tpu.dimension_semantics<parallel>, #tpu.dimension_semantics<arbitrary>], iteration_bounds = array<i64: 1, 4>, scalar_prefetch = 0 : i64, scratch_operands = 1 : i64, tpu.core_type = #tpu.core_type<tc>, window_params = [{transform_indices = @transform_0, window_bounds = array<i64: 1, 8, 128>}, {pipeline_mode = #tpu.pipeline_mode<synchronous>, transform_indices = @transform_1, window_bounds = array<i64: 256, 384>}, {pipeline_mode = #tpu.pipeline_mode<synchronous>, transform_indices = @transform_2, window_bounds = array<i64: 1, 384>}, {transform_indices = @transform_3, window_bounds = array<i64: 1, 8, 128>}, {transform_indices = @transform_4, window_bounds = array<i64: 8, 128>}]} {
    %c0_i32 = arith.constant 0 : i32
    %0 = arith.cmpi eq, %arg1, %c0_i32 : i32
    %1 = arith.extui %0 : i1 to i32
    %c0_i32_0 = arith.constant 0 : i32
    %2 = arith.cmpi ne, %1, %c0_i32_0 : i32
    scf.if %2 {
      %cst_19 = arith.constant 0.000000e+00 : f32
      %46 = vector.broadcast %cst_19 : f32 to vector<8x128xf32>
      %c0_20 = arith.constant 0 : index
      %c0_21 = arith.constant 0 : index
      %47 = vector.load %arg7[%c0_20, %c0_21] : memref<8x128xf32, #tpu.memory_space<vmem>>, vector<8x128xf32>
      tpu.vector_store %arg7[%c0_20, %c0_21], %46 {strides = array<i32>} : memref<8x128xf32, #tpu.memory_space<vmem>>, vector<8x128xf32>,
    } else {
    }
    %c0 = arith.constant 0 : index
    %c0_1 = arith.constant 0 : index
    %3 = vector.load %arg7[%c0, %c0_1] : memref<8x128xf32, #tpu.memory_space<vmem>>, vector<8x128xf32>
    %c0_2 = arith.constant 0 : index
    %c0_3 = arith.constant 0 : index
    %c0_4 = arith.constant 0 : index
    %4 = vector.load %arg2[%c0_2, %c0_3, %c0_4] : memref<1x8x128xf32, #tpu.memory_space<vmem>>, vector<1x8x128xf32>
    %5 = vector.shape_cast %4 : vector<1x8x128xf32> to vector<8x128xf32>
    %6 = tpu.concatenate %3, %5 in 1 : vector<8x128xf32>, vector<8x128xf32> -> vector<8x256xf32>
    %7 = arith.truncf %6 : vector<8x256xf32> to vector<8x256xbf16>
    %c0_5 = arith.constant 0 : index
    %c0_6 = arith.constant 0 : index
    %8 = vector.load %arg3[%c0_5, %c0_6] : memref<256x384xbf16, #tpu.memory_space<vmem>>, vector<256x384xbf16>
    %cst = arith.constant dense<0.000000e+00> : vector<8x384xf32>
    %9 = tpu.matmul %7, %8, %cst {dimension_numbers = #tpu.dot_dimension_numbers<[1], [0], [0], [1], [0, 0, 1, 1], [], []>} : vector<8x256xbf16>, vector<256x384xbf16>, vector<8x384xf32> -> vector<8x384xf32>
    %c0_7 = arith.constant 0 : index
    %c0_8 = arith.constant 0 : index
    %10 = vector.load %arg4[%c0_7, %c0_8] : memref<1x384xf32, #tpu.memory_space<vmem>>, vector<1x384xf32>
    %11 = vector.broadcast %10 : vector<1x384xf32> to vector<8x384xf32>
    %12 = arith.addf %9, %11 : vector<8x384xf32>
    %13 = vector.extract_strided_slice %12 {offsets = [0, 0], sizes = [8, 128], strides = [1, 1]} : vector<8x384xf32> to vector<8x128xf32>
    %14 = arith.negf %13 : vector<8x128xf32>
    %15 = math.exp %14 : vector<8x128xf32>
    %cst_9 = arith.constant 1.000000e+00 : f32
    %16 = vector.broadcast %cst_9 : f32 to vector<8x128xf32>
    %17 = arith.addf %16, %15 : vector<8x128xf32>
    %18 = arith.divf %16, %17 : vector<8x128xf32>
    %19 = vector.extract_strided_slice %12 {offsets = [0, 128], sizes = [8, 128], strides = [1, 1]} : vector<8x384xf32> to vector<8x128xf32>
    %20 = math.tanh %19 : vector<8x128xf32>
    %21 = vector.extract_strided_slice %12 {offsets = [0, 256], sizes = [8, 128], strides = [1, 1]} : vector<8x384xf32> to vector<8x128xf32>
    %22 = arith.negf %21 : vector<8x128xf32>
    %23 = math.exp %22 : vector<8x128xf32>
    %cst_10 = arith.constant 1.000000e+00 : f32
    %24 = vector.broadcast %cst_10 : f32 to vector<8x128xf32>
    %25 = arith.addf %24, %23 : vector<8x128xf32>
    %26 = arith.divf %24, %25 : vector<8x128xf32>
    %27 = arith.subf %3, %5 : vector<8x128xf32>
    %28 = arith.mulf %18, %27 : vector<8x128xf32>
    %29 = arith.addf %5, %28 : vector<8x128xf32>
    %30 = arith.subf %29, %26 : vector<8x128xf32>
    %cst_11 = arith.constant 0.000000e+00 : f32
    %31 = vector.broadcast %cst_11 : f32 to vector<8x128xf32>
    %32 = arith.cmpf oge, %30, %31 : vector<8x128xf32>
    %cst_12 = arith.constant 0.000000e+00 : f32
    %33 = vector.broadcast %cst_12 : f32 to vector<8x128xf32>
    %34 = arith.select %32, %33, %29 : vector<8x128xi1>, vector<8x128xf32>
    %35 = arith.addf %34, %20 : vector<8x128xf32>
    %c0_13 = arith.constant 0 : index
    %c0_14 = arith.constant 0 : index
    %36 = vector.load %arg7[%c0_13, %c0_14] : memref<8x128xf32, #tpu.memory_space<vmem>>, vector<8x128xf32>
    tpu.vector_store %arg7[%c0_13, %c0_14], %35 {strides = array<i32>} : memref<8x128xf32, #tpu.memory_space<vmem>>, vector<8x128xf32>,
    %37 = arith.extui %32 : vector<8x128xi1> to vector<8x128xi32>
    %38 = arith.sitofp %37 : vector<8x128xi32> to vector<8x128xf32>
    %39 = arith.truncf %38 : vector<8x128xf32> to vector<8x128xbf16>
    %c0_15 = arith.constant 0 : index
    %c0_16 = arith.constant 0 : index
    %c0_17 = arith.constant 0 : index
    %40 = vector.load %arg5[%c0_15, %c0_16, %c0_17] : memref<1x8x128xbf16, #tpu.memory_space<vmem>>, vector<1x8x128xbf16>
    %41 = vector.shape_cast %40 : vector<1x8x128xbf16> to vector<8x128xbf16>
    %42 = vector.shape_cast %39 : vector<8x128xbf16> to vector<1x8x128xbf16>
    tpu.vector_store %arg5[%c0_15, %c0_16, %c0_17], %42 {strides = array<i32>} : memref<1x8x128xbf16, #tpu.memory_space<vmem>>, vector<1x8x128xbf16>,
    %c3_i32 = arith.constant 3 : i32
    %43 = arith.cmpi eq, %arg1, %c3_i32 : i32
    %44 = arith.extui %43 : i1 to i32
    %c0_i32_18 = arith.constant 0 : i32
    %45 = arith.cmpi ne, %44, %c0_i32_18 : i32
    scf.if %45 {
      %c0_19 = arith.constant 0 : index
      %c0_20 = arith.constant 0 : index
      %46 = vector.load %arg6[%c0_19, %c0_20] : memref<8x128xf32, #tpu.memory_space<vmem>>, vector<8x128xf32>
      tpu.vector_store %arg6[%c0_19, %c0_20], %35 {strides = array<i32>} : memref<8x128xf32, #tpu.memory_space<vmem>>, vector<8x128xf32>,
    } else {
    }
    return
  }
  func.func @transform_0(%arg0: i32, %arg1: i32) -> (i32, i32, i32) {
    %c0_i32 = arith.constant 0 : i32
    %c0_i32_0 = arith.constant 0 : i32
    return %arg1, %arg0, %c0_i32 : i32, i32, i32
  }
  func.func @transform_1(%arg0: i32, %arg1: i32) -> (i32, i32) {
    %c0_i32 = arith.constant 0 : i32
    %c0_i32_0 = arith.constant 0 : i32
    %c0_i32_1 = arith.constant 0 : i32
    return %c0_i32, %c0_i32_0 : i32, i32
  }
  func.func @transform_2(%arg0: i32, %arg1: i32) -> (i32, i32) {
    %c0_i32 = arith.constant 0 : i32
    %c0_i32_0 = arith.constant 0 : i32
    %c0_i32_1 = arith.constant 0 : i32
    return %c0_i32, %c0_i32_0 : i32, i32
  }
  func.func @transform_3(%arg0: i32, %arg1: i32) -> (i32, i32, i32) {
    %c0_i32 = arith.constant 0 : i32
    %c0_i32_0 = arith.constant 0 : i32
    return %arg1, %arg0, %c0_i32 : i32, i32, i32
  }
  func.func @transform_4(%arg0: i32, %arg1: i32) -> (i32, i32) {
    %c0_i32 = arith.constant 0 : i32
    %c0_i32_0 = arith.constant 0 : i32
    return %arg0, %c0_i32 : i32, i32
  }
}

</mosaic_0001>

<bundles_post_ra>
// kernel: gpn_forward.1
= control target key start
LH: loop header
LB: loop body
LE: loop exit
PB: predicated region body
PF: predicated region fallthrough
CT: control target
= control target key end

     0   :  { %10 = vsyncpa [#allocation4], 0  ;;  %s1721_s0 = inlined_call_operand.vmem [shape: f32[4,8,128], index: 0, kind: input, shape index: {}]   ;;  %s1722_s1 = inlined_call_operand.vmem [shape: bf16[256,384], index: 1, kind: input, shape index: {}]   ;;  %s1723_s2 = inlined_call_operand.vmem [shape: f32[1,384], index: 2, kind: input, shape index: {}]   ;;  %s1724_s3 = inlined_call_operand.hbm [shape: bf16[4,8,128], index: 3, kind: output, shape index: {0}]   ;;  %s1725_s4 = inlined_call_operand.hbm [shape: f32[8,128], index: 4, kind: output, shape index: {1}]  }
   0x1   :  { %12 = vsyncpa [#allocation4 + $0x1], 0 }
   0x2   :  { %13 = vsyncpa [#allocation6], 0  ;;  %s1281_s15 = smov 0   ;;  %s1283_s16 = smov 0  }
   0x3   :  { %s1285_s17 = smov 0   ;;  %s1287_s18 = smov 0  }
   0x4   :  { %s1289_s19 = smov 0   ;;  %s1291_s20 = smov 0  }
   0x5 LB: > { %s809_s21 = sadd.s32 4294967295, %s1251_s20   ;;  %s810_s22 = sadd.s32 4294967294, %s1251_s20   ;;  %s1251_s20 = sphi %s1291_s20, %s19_s20   ;;  %s1247_s19 = sphi %s1289_s19, %s1733_s19   ;;  %s1243_s18 = sphi %s1287_s18, %s1732_s18   ;;  %s1239_s17 = sphi %s1285_s17, %s1731_s17   ;;  %s1235_s16 = sphi %s1283_s16, %s1730_s16   ;;  %s1231_s15 = sphi %s1281_s15, %s1729_s15  }
   0x6   : > { %s28_s23 = sadd.s32 1, %s1247_s19  ;;  %s110_s24 = sadd.s32 1, %s1239_s17 }
   0x7   : > { %p29_p0 = scmp.ge.s32.totalorder %s28_s23, 4  ;;  %p120_p1 = scmp.ne.s32.totalorder %s1239_s17, %s1235_s16 }
   0x8   : > { %p1317_p2 = scmp.eq.s32.totalorder %s809_s21, 3  ;;  %p126_p3 = scmp.ne.s32.totalorder %s1235_s16, %s1231_s15 }
   0x9   : > { %s1735_s23 = smov (%p29_p0, %s28_s23), 0  ;;  %p127_p5 = scmp.eq.s32.totalorder %s810_s22, 3 }
   0xa   : > { %p1327_p4 = por %p1317_p2, %p120_p1  ;;  %s105_s27 = ssub.s32 %s1247_s19, %s1735_s23 }
   0xb   : > { %p813_p6 = scmp.ge.s32.totalorder %s1251_s20, 1  ;;  %p108_p7 = scmp.eq.s32.totalorder %s105_s27, 0 }
   0xc   : > { %p1334_p8 = por %p127_p5, %p126_p3  ;;  %p187_p9 = scmp.lt.s32.totalorder %s1251_s20, 5 }
   0xd   : > { %s1340_s29 = scalar_select %p108_p7, %s1239_s17, %s110_s24  }
   0xe   : > { %p188_p10 = pnand %p813_p6, %p187_p9 }
   0xf   : > { %s210_s30 = sand.u32 (!%p188_p10), 1, %s1235_s16   ;;  %p215_p11 = scmp.lt.s32.totalorder (!%p188_p10), %s1243_s18, 3 }
  0x10   : > { %191 = sbr.rel (%p188_p10) target bundleno = 282 (0x11a), region = 32  ;;  %s1346_s5 = sshll.u32 (!%p188_p10), %s210_s30, 2 }
  0x11   : > { %s212_s11 = scalar_lea.vmem (!%p188_p10), [#allocation3], %s1346_s5  ;;  %p816_p12 = scmp.ne.s32.totalorder (!%p188_p10), %s1243_s18, 0 }
  0x15   : > { %s216_s6 = scalar_select %p215_p11, %s1243_s18, 3 }
  0x16   : > { %225 = sbr.rel (%p816_p12) target bundleno = 29 (0x1d), region = 36 }
  0x17   : > { %s815_s7 = sshll.u32 %s216_s6, 3 }
  0x18   : > { %s1352_s10 = scalar_lea.vmem %s1721_s0, %s815_s7 }
  0x1b   : > { %v1253_v0 = vmov 0.0  }
  0x1c   : > { %226 = vst [vmem:[#allocation2] sm:$0xff] %v1253_v0 }
  0x1d PF: > { %v903_v1 = vld [vmem:[%s1722_s1 + $0xa8] sm:$0xf]  ;;  %v1041_v2 = vld [vmem:[%s1722_s1 + $0xb0] sm:$0xf0]  ;;  %v891_v6 = vld [vmem:[%s1722_s1 + $0x90] sm:$0xf] }
  0x1e   : > { %v999_v3 = vld [vmem:[%s1722_s1 + $0x168] sm:$0xf]  ;;  %v904_v4 = vor.u32 %v1041_v2, %v903_v1  ;;  %v1065_v5 = vld [vmem:[%s1722_s1 + $0x170] sm:$0xf0]  ;;  %v1038_v7 = vld [vmem:[%s1722_s1 + $0x98] sm:$0xf0] }
  0x1f   : > { %v1000_v8 = vor.u32 %v1065_v5, %v999_v3  ;;  %v987_v9 = vld [vmem:[%s1722_s1 + $0x150] sm:$0xf]  ;;  %v1062_v10 = vld [vmem:[%s1722_s1 + $0x158] sm:$0xf0]  ;;  %v892_v11 = vor.u32 %v1038_v7, %v891_v6  ;;  %v879_v13 = vld [vmem:[%s1722_s1 + $0x78] sm:$0xf] }
  0x20   : > { %559 = vmatpush.bf16.msra.mxu0 %v904_v4  ;;  %v988_v12 = vor.u32 %v1062_v10, %v987_v9  ;;  %v1035_v14 = vld [vmem:[%s1722_s1 + $0x80] sm:$0xf0]  ;;  %v975_v15 = vld [vmem:[%s1722_s1 + $0x138] sm:$0xf]  ;;  %v867_v19 = vld [vmem:[%s1722_s1 + $0x60] sm:$0xf] }
  0x21   : > { %572 = vmatpush.bf16.msra.mxu1 %v1000_v8  ;;  %v1059_v16 = vld [vmem:[%s1722_s1 + $0x140] sm:$0xf0]  ;;  %v880_v17 = vor.u32 %v1035_v14, %v879_v13  ;;  %v1032_v20 = vld [vmem:[%s1722_s1 + $0x68] sm:$0xf0]  ;;  %v963_v21 = vld [vmem:[%s1722_s1 + $0x120] sm:$0xf] }
  0x22   : > { %v976_v18 = vor.u32 %v1059_v16, %v975_v15  ;;  %v1056_v22 = vld [vmem:[%s1722_s1 + $0x128] sm:$0xf0]  ;;  %v868_v23 = vor.u32 %v1032_v20, %v867_v19  ;;  %v855_v25 = vld [vmem:[%s1722_s1 + $0x48] sm:$0xf]  ;;  %v1029_v26 = vld [vmem:[%s1722_s1 + $0x50] sm:$0xf0] }
  0x23   : > { %v964_v24 = vor.u32 %v1056_v22, %v963_v21  ;;  %v951_v27 = vld [vmem:[%s1722_s1 + $0x108] sm:$0xf]  ;;  %v1053_v28 = vld [vmem:[%s1722_s1 + $0x110] sm:$0xf0]  ;;  %v856_v29 = vor.u32 %v1029_v26, %v855_v25  ;;  %v1040_v30 = vld [vmem:[%s1722_s1 + $0xac] sm:$0xf] }
  0x24   : > { %560 = vmatpush.bf16.msra.mxu0 %v892_v11  ;;  %v905_v31 = vld [vmem:[%s1722_s1 + $0xb4] sm:$0xf0]  ;;  %v952_v32 = vor.u32 %v1053_v28, %v951_v27  ;;  %v843_v33 = vld [vmem:[%s1722_s1 + $0x30] sm:$0xf]  ;;  %v1026_v34 = vld [vmem:[%s1722_s1 + $0x38] sm:$0xf0] }
  0x25   : > { %573 = vmatpush.bf16.msra.mxu1 %v988_v12  ;;  %v939_v35 = vld [vmem:[%s1722_s1 + $0xf0] sm:$0xf]  ;;  %v908_v36 = vor.u32 %v1040_v30, %v905_v31  ;;  %v1050_v37 = vld [vmem:[%s1722_s1 + $0xf8] sm:$0xf0]  ;;  %v1064_v38 = vld [vmem:[%s1722_s1 + $0x16c] sm:$0xf]  ;;  %v844_v43 = vor.u32 %v1026_v34, %v843_v33 }
  0x26   : > { %v1001_v39 = vld [vmem:[%s1722_s1 + $0x174] sm:$0xf0]  ;;  %v1037_v41 = vld [vmem:[%s1722_s1 + $0x94] sm:$0xf]  ;;  %v893_v42 = vld [vmem:[%s1722_s1 + $0x9c] sm:$0xf0]  ;;  %v940_v47 = vor.u32 %v1050_v37, %v939_v35 }
  0x27   : > { %585 = vmatpush.bf16.msra.mxu2 %v908_v36  ;;  %v1004_v40 = vor.u32 %v1064_v38, %v1001_v39  ;;  %v831_v44 = vld [vmem:[%s1722_s1 + $0x18] sm:$0xf]  ;;  %v1023_v45 = vld [vmem:[%s1722_s1 + $0x20] sm:$0xf0]  ;;  %v896_v46 = vor.u32 %v1037_v41, %v893_v42  ;;  %v1061_v48 = vld [vmem:[%s1722_s1 + $0x154] sm:$0xf] }
  0x28   : > { %561 = vmatpush.bf16.msra.mxu0 %v880_v17  ;;  %v989_v49 = vld [vmem:[%s1722_s1 + $0x15c] sm:$0xf0]  ;;  %v1034_v50 = vld [vmem:[%s1722_s1 + $0x7c] sm:$0xf]  ;;  %v927_v51 = vld [vmem:[%s1722_s1 + $0xd8] sm:$0xf]  ;;  %v832_v58 = vor.u32 %v1023_v45, %v831_v44 }
  0x29   : > { %574 = vmatpush.bf16.msra.mxu1 %v976_v18  ;;  %598 = vmatpush.bf16.msra.mxu3 %v1004_v40  ;;  %v1047_v52 = vld [vmem:[%s1722_s1 + $0xe0] sm:$0xf0]  ;;  %v992_v53 = vor.u32 %v1061_v48, %v989_v49  ;;  %v881_v54 = vld [vmem:[%s1722_s1 + $0x84] sm:$0xf0]  ;;  %v819_v55 = vld [vmem:[%s1722_s1] sm:$0xf] }
  0x2a   : > { %v884_v56 = vor.u32 %v1034_v50, %v881_v54  ;;  %v1058_v57 = vld [vmem:[%s1722_s1 + $0x13c] sm:$0xf]  ;;  %v977_v59 = vld [vmem:[%s1722_s1 + $0x144] sm:$0xf0]  ;;  %v1031_v60 = vld [vmem:[%s1722_s1 + $0x64] sm:$0xf]  ;;  %v928_v62 = vor.u32 %v1047_v52, %v927_v51 }
  0x2b   : > { %586 = vmatpush.bf16.msra.mxu2 %v896_v46  ;;  %v869_v61 = vld [vmem:[%s1722_s1 + $0x6c] sm:$0xf0]  ;;  %v1020_v63 = vld [vmem:[%s1722_s1 + $0x8] sm:$0xf0]  ;;  %v915_v0 = vld [vmem:[%s1722_s1 + $0xc0] sm:$0xf]  ;;  %v980_v2 = vor.u32 %v1058_v57, %v977_v59 }
  0x2c   : > { %562 = vmatpush.bf16.msra.mxu0 %v868_v23  ;;  %v1044_v1 = vld [vmem:[%s1722_s1 + $0xc8] sm:$0xf0]  ;;  %v911_v3 = vld [vmem:[%s1722_s1 + $0xb0] sm:$0xf]  ;;  %v1042_v4 = vld [vmem:[%s1722_s1 + $0xb8] sm:$0xf0]  ;;  %v872_v7 = vor.u32 %v1031_v60, %v869_v61  ;;  %v820_v10 = vor.u32 %v1020_v63, %v819_v55 }
  0x2d   : > { %575 = vmatpush.bf16.msra.mxu1 %v964_v24  ;;  %599 = vmatpush.bf16.msra.mxu3 %v992_v53  ;;  %v1007_v5 = vld [vmem:[%s1722_s1 + $0x170] sm:$0xf]  ;;  %v1066_v6 = vld [vmem:[%s1722_s1 + $0x178] sm:$0xf0]  ;;  %v1055_v8 = vld [vmem:[%s1722_s1 + $0x124] sm:$0xf]  ;;  %v916_v14 = vor.u32 %v1044_v1, %v915_v0  ;;  %v912_v15 = vor.u32 %v1042_v4, %v911_v3 }
  0x2e   : > { %v965_v9 = vld [vmem:[%s1722_s1 + $0x12c] sm:$0xf0]  ;;  %v1512_v11 = vld [vmem:[#allocation2] sm:$0xff]  ;;  %v1028_v12 = vld [vmem:[%s1722_s1 + $0x4c] sm:$0xf]  ;;  %v1008_v17 = vor.u32 %v1066_v6, %v1007_v5  ;;  %p1012_p13 = scmp.ne.s32.totalorder %s1243_s18, 3 }
  0x2f   : > { %587 = vmatpush.bf16.msra.mxu2 %v884_v56  ;;  %v857_v13 = vld [vmem:[%s1722_s1 + $0x54] sm:$0xf0]  ;;  %v1521_v16 = vld [vmem:[%s1352_s10] sm:$0xff]  ;;  %v968_v21 = vor.u32 %v1055_v8, %v965_v9  ;;  %v1534_v22 = vpack.c.bf16 %v1512_v11, %v1512_v11  ;;  %v1052_v25 = vld [vmem:[%s1722_s1 + $0x10c] sm:$0xf] }
  0x30   : > { %563 = vmatpush.bf16.msra.mxu0 %v856_v29  ;;  %v899_v18 = vld [vmem:[%s1722_s1 + $0x98] sm:$0xf]  ;;  %v1039_v19 = vld [vmem:[%s1722_s1 + $0xa0] sm:$0xf0]  ;;  %v860_v24 = vor.u32 %v1028_v12, %v857_v13  ;;  %v1547_v27 = vpack.c.bf16 %v1521_v16, %v1521_v16  ;;  %v1025_v28 = vld [vmem:[%s1722_s1 + $0x34] sm:$0xf] }
  0x31   : > { %576 = vmatpush.bf16.msra.mxu1 %v952_v32  ;;  %600 = vmatpush.bf16.msra.mxu3 %v980_v2  ;;  %v995_v20 = vld [vmem:[%s1722_s1 + $0x158] sm:$0xf]  ;;  %v1063_v23 = vld [vmem:[%s1722_s1 + $0x160] sm:$0xf0]  ;;  %v845_v29 = vld [vmem:[%s1722_s1 + $0x3c] sm:$0xf0]  ;;  %v900_v30 = vor.u32 %v1039_v19, %v899_v18 }
  0x32   : > { %v953_v26 = vld [vmem:[%s1722_s1 + $0x114] sm:$0xf0]  ;;  %v996_v31 = vor.u32 %v1063_v23, %v995_v20  ;;  %v887_v32 = vld [vmem:[%s1722_s1 + $0x80] sm:$0xf]  ;;  %v1036_v33 = vld [vmem:[%s1722_s1 + $0x88] sm:$0xf0]  ;;  %v848_v37 = vor.u32 %v1025_v28, %v845_v29 }
  0x33   : > { %588 = vmatpush.bf16.msra.mxu2 %v872_v7  ;;  %v983_v34 = vld [vmem:[%s1722_s1 + $0x140] sm:$0xf]  ;;  %v956_v35 = vor.u32 %v1052_v25, %v953_v26  ;;  %v1060_v36 = vld [vmem:[%s1722_s1 + $0x148] sm:$0xf0]  ;;  %v1049_v38 = vld [vmem:[%s1722_s1 + $0xf4] sm:$0xf]  ;;  %v888_v42 = vor.u32 %v1036_v33, %v887_v32 }
  0x34   : > { %564 = vmatpush.bf16.msra.mxu0 %v844_v43  ;;  %v941_v39 = vld [vmem:[%s1722_s1 + $0xfc] sm:$0xf0]  ;;  %v1022_v40 = vld [vmem:[%s1722_s1 + $0x1c] sm:$0xf]  ;;  %v833_v41 = vld [vmem:[%s1722_s1 + $0x24] sm:$0xf0]  ;;  %v984_v43 = vor.u32 %v1060_v36, %v983_v34 }
  0x35   : > { %577 = vmatpush.bf16.msra.mxu1 %v940_v47  ;;  %601 = vmatpush.bf16.msra.mxu3 %v968_v21  ;;  %v875_v44 = vld [vmem:[%s1722_s1 + $0x68] sm:$0xf]  ;;  %v1033_v45 = vld [vmem:[%s1722_s1 + $0x70] sm:$0xf0]  ;;  %v944_v47 = vor.u32 %v1049_v38, %v941_v39  ;;  %v836_v49 = vor.u32 %v1022_v40, %v833_v41  ;;  %v1046_v50 = vld [vmem:[%s1722_s1 + $0xdc] sm:$0xf] }
  0x36   : > { %v971_v46 = vld [vmem:[%s1722_s1 + $0x128] sm:$0xf]  ;;  %v1057_v48 = vld [vmem:[%s1722_s1 + $0x130] sm:$0xf0]  ;;  %v1019_v52 = vld [vmem:[%s1722_s1 + $0x4] sm:$0xf]  ;;  %v876_v54 = vor.u32 %v1033_v45, %v875_v44 }
  0x37   : > { %589 = vmatpush.bf16.msra.mxu2 %v860_v24  ;;  %v929_v51 = vld [vmem:[%s1722_s1 + $0xe4] sm:$0xf0]  ;;  %v821_v53 = vld [vmem:[%s1722_s1 + $0xc] sm:$0xf0]  ;;  %v972_v55 = vor.u32 %v1057_v48, %v971_v46  ;;  %v1030_v57 = vld [vmem:[%s1722_s1 + $0x58] sm:$0xf0] }
  0x38   : > { %565 = vmatpush.bf16.msra.mxu0 %v832_v58  ;;  %v863_v56 = vld [vmem:[%s1722_s1 + $0x50] sm:$0xf]  ;;  %v932_v59 = vor.u32 %v1046_v50, %v929_v51  ;;  %v1054_v60 = vld [vmem:[%s1722_s1 + $0x118] sm:$0xf0]  ;;  %v824_v61 = vor.u32 %v1019_v52, %v821_v53  ;;  %v851_v2 = vld [vmem:[%s1722_s1 + $0x38] sm:$0xf] }
  0x39   : > { %578 = vmatpush.bf16.msra.mxu1 %v928_v62  ;;  %602 = vmatpush.bf16.msra.mxu3 %v956_v35  ;;  %v959_v58 = vld [vmem:[%s1722_s1 + $0x110] sm:$0xf]  ;;  %v1043_v62 = vld [vmem:[%s1722_s1 + $0xc4] sm:$0xf]  ;;  %v864_v0 = vor.u32 %v1030_v57, %v863_v56  ;;  %v947_v5 = vld [vmem:[%s1722_s1 + $0xf8] sm:$0xf] }
  0x3a   : > { %v917_v63 = vld [vmem:[%s1722_s1 + $0xcc] sm:$0xf0]  ;;  %v960_v1 = vor.u32 %v1054_v60, %v959_v58  ;;  %v1027_v3 = vld [vmem:[%s1722_s1 + $0x40] sm:$0xf0]  ;;  %v839_v9 = vld [vmem:[%s1722_s1 + $0x20] sm:$0xf]  ;;  %v676_v60 = vsub.f32 %v1512_v11, %v1521_v16 }
  0x3b   : > { %590 = vmatpush.bf16.msra.mxu2 %v848_v37  ;;  %v920_v4 = vor.u32 %v1043_v62, %v917_v63  ;;  %v1051_v6 = vld [vmem:[%s1722_s1 + $0x100] sm:$0xf0]  ;;  %v852_v7 = vor.u32 %v1027_v3, %v851_v2  ;;  %v935_v12 = vld [vmem:[%s1722_s1 + $0xe0] sm:$0xf]  ;;  %v1048_v13 = vld [vmem:[%s1722_s1 + $0xe8] sm:$0xf0] }
  0x3c   : > { %566 = vmatpush.bf16.msra.mxu0 %v820_v10  ;;  %v948_v8 = vor.u32 %v1051_v6, %v947_v5  ;;  %v1024_v10 = vld [vmem:[%s1722_s1 + $0x28] sm:$0xf0]  ;;  %v1021_v18 = vld [vmem:[%s1722_s1 + $0x10] sm:$0xf0]  ;;  %v923_v19 = vld [vmem:[%s1722_s1 + $0xc8] sm:$0xf] }
  0x3d   : > { %579 = vmatpush.bf16.msra.mxu1 %v916_v14  ;;  %603 = vmatpush.bf16.msra.mxu3 %v944_v47  ;;  %v840_v14 = vor.u32 %v1024_v10, %v839_v9  ;;  %v1045_v20 = vld [vmem:[%s1722_s1 + $0xd0] sm:$0xf0]  ;;  %v295_v24 = vld [vmem:[%s1723_s2] sm:$0x7] }
  0x3e   : > { %v924_v23 = vor.u32 %v1045_v20, %v923_v19  ;;  %v297_v25 = vperm.slane %v295_v24, 0  ;;  %v298_v53 = vperm.slane %v295_v24, 1 }
  0x3f   : > { %567 = vmatmul.bf16.vlgmr.msra.gmra.mxu0 %v1534_v22  ;;  %591 = vmatpush.bf16.msra.mxu2 %v836_v49 }
  0x40   : > { %611 = vmatpush.bf16.msrb.mxu0 %v912_v15  ;;  %580 = vmatmul.bf16.vlgmr.msra.gmra.mxu1 %v1547_v27  ;;  %v936_v15 = vor.u32 %v1048_v13, %v935_v12  ;;  %v1254_v13 = vmov 0.0  }
  0x41   : > { %624 = vmatpush.bf16.msrb.mxu1 %v1008_v17  ;;  %604 = vmatpush.bf16.msra.mxu3 %v932_v59  ;;  %v827_v17 = vld [vmem:[%s1722_s1 + $0x8] sm:$0xf] }
  0x42   : > { %v828_v21 = vor.u32 %v1021_v18, %v827_v17 }
  0x43   : > { %592 = vmatpush.bf16.msra.mxu2 %v824_v61 }
  0x44   : > { %612 = vmatpush.bf16.msrb.mxu0 %v900_v30 }
  0x45   : > { %625 = vmatpush.bf16.msrb.mxu1 %v996_v31  ;;  %605 = vmatpush.bf16.msra.mxu3 %v920_v4 }
  0x46   : > { %593 = vmatmul.bf16.vlgmr.msra.gmra.mxu2 %v1534_v22 }
  0x48   : > { %613 = vmatpush.bf16.msrb.mxu0 %v888_v42  ;;  %606 = vmatmul.bf16.vlgmr.msra.gmra.mxu3 %v1547_v27 }
  0x49   : > { %626 = vmatpush.bf16.msrb.mxu1 %v984_v43 }
  0x4c   : > { %614 = vmatpush.bf16.msrb.mxu0 %v876_v54 }
  0x4d   : > { %627 = vmatpush.bf16.msrb.mxu1 %v972_v55 }
  0x50   : > { %615 = vmatpush.bf16.msrb.mxu0 %v864_v0 }
  0x51   : > { %628 = vmatpush.bf16.msrb.mxu1 %v960_v1 }
  0x54   : > { %616 = vmatpush.bf16.msrb.mxu0 %v852_v7 }
  0x55   : > { %629 = vmatpush.bf16.msrb.mxu1 %v948_v8 }
  0x58   : > { %617 = vmatpush.bf16.msrb.mxu0 %v840_v14 }
  0x59   : > { %630 = vmatpush.bf16.msrb.mxu1 %v936_v15 }
  0x5c   : > { %618 = vmatpush.bf16.msrb.mxu0 %v828_v21 }
  0x5d   : > { %631 = vmatpush.bf16.msrb.mxu1 %v924_v23 }
  0x5f   : > { %619 = vmatmul.bf16.vlgmr.msrb.gmra.mxu0 %v1534_v22  ;;  %v299_v22 = vperm.slane %v295_v24, 2 }
  0x60   : > { %632 = vmatmul.bf16.vlgmr.msrb.gmra.mxu1 %v1547_v27 }
  0xbc   : > { %v568_v26 = vpop.f32.mrf.mxu0 }
  0xbd   : > { %v569_v28 = vadd.f32 %v568_v26, %v297_v25  ;;  %v581_v29 = vpop.f32.mrf.mxu1 }
  0xbf   : > { %v582_v30 = vadd.f32 %v581_v29, %v569_v28 }
  0xc1   : > { %v1009_v31 = vmul.f32 -1.442695, %v582_v30 }
  0xc3   : > { %1131 = vpow2.f32 %v1009_v31 }
  0xc4   : > { %v570_v32 = vpop.f32.mrf.mxu0 }
  0xc5   : > { %v583_v33 = vpop.f32.mrf.mxu1 }
  0xc9   : > { %v1132_v34 = vpop.eup %1131  ;;  %v594_v36 = vpop.f32.mrf.mxu2 }
  0xca   : > { %v640_v35 = vadd.f32 1.0, %v1132_v34  ;;  %v595_v57 = vadd.f32 %v594_v36, %v298_v53 }
  0xcb   : > { %v607_v37 = vpop.f32.mrf.mxu3 }
  0xcc   : > { %1133 = vrcp.f32 %v640_v35  ;;  %vm646_vm0 = vweird.f32 %v640_v35  ;;  %v652_v52 = vand.u32 2147483648, %v640_v35  ;;  %v650_v55 = vand.u32 2147483647, %v640_v35 }
  0xcd   : > { %v608_v62 = vadd.f32 %v607_v37, %v595_v57 }
  0xce   : > { %v653_v56 = vor.u32 1.1754944e-38, %v652_v52  ;;  %vm651_vm3 = vcmp.eq.f32.partialorder %v650_v55, 8.507059e+37 }
  0xd1   : > { %v596_v40 = vpop.f32.mrf.mxu2 }
  0xd2   : > { %v1134_v41 = vpop.eup %1133 }
  0xd3   : > { %v609_v43 = vpop.f32.mrf.mxu3  ;;  %v642_v44 = vmul.f32 %v1134_v41, %v640_v35  ;;  %vm647_vm1 = vweird.f32 %v1134_v41 }
  0xd4   : > { %vm648_vm2 = vmor %vm646_vm0, %vm647_vm1 }
  0xd5   : > { %v643_v47 = vsub.f32 1.0, %v642_v44 }
  0xd7   : > { %v644_v50 = vmul.f32 %v1134_v41, %v643_v47 }
  0xd9   : > { %v645_v54 = vadd.f32 %v1134_v41, %v644_v50 }
  0xdb   : > { %v649_v58 = vsel %vm648_vm2, %v1134_v41, %v645_v54 }
  0xdc   : > { %v620_v27 = vpop.f32.mrf.mxu0  ;;  %v654_v63 = vsel %vm651_vm3, %v653_v56, %v649_v58 }
  0xdd   : > { %v621_v38 = vadd.f32 %v620_v27, %v299_v22  ;;  %v633_v39 = vpop.f32.mrf.mxu1  ;;  %v677_v4 = vmul.f32 %v676_v60, %v654_v63 }
  0xdf   : > { %v634_v42 = vadd.f32 %v633_v39, %v621_v38  ;;  %v678_v8 = vadd.f32 %v677_v4, %v1521_v16 }
  0xe1   : > { %v1010_v45 = vmul.f32 -1.442695, %v634_v42 }
  0xe3   : > { %1135 = vpow2.f32 %v1010_v45 }
  0xe4   : > { %v622_v46 = vpop.f32.mrf.mxu0 }
  0xe5   : > { %v635_v48 = vpop.f32.mrf.mxu1 }
  0xe9   : > { %v1136_v49 = vpop.eup %1135 }
  0xea   : > { %v660_v51 = vadd.f32 1.0, %v1136_v49 }
  0xec   : > { %1137 = vrcp.f32 %v660_v51  ;;  %v672_v1 = vand.u32 2147483648, %v660_v51  ;;  %v670_v3 = vand.u32 2147483647, %v660_v51  ;;  %vm666_vm5 = vweird.f32 %v660_v51 }
  0xed   : > { %1139 = vtanh.f32 %v608_v62 }
  0xee   : > { %v673_v6 = vor.u32 1.1754944e-38, %v672_v1  ;;  %vm671_vm7 = vcmp.eq.f32.partialorder %v670_v3, 8.507059e+37 }
  0xf2   : > { %v1138_v59 = vpop.eup %1137 }
  0xf3   : > { %v662_v61 = vmul.f32 %v1138_v59, %v660_v51  ;;  %vm667_vm4 = vweird.f32 %v1138_v59  ;;  %v1140_v10 = vpop.eup %1139 }
  0xf4   : > { %vm668_vm6 = vmor %vm666_vm5, %vm667_vm4 }
  0xf5   : > { %v663_v0 = vsub.f32 1.0, %v662_v61 }
  0xf7   : > { %v664_v2 = vmul.f32 %v1138_v59, %v663_v0 }
  0xf9   : > { %v665_v5 = vadd.f32 %v1138_v59, %v664_v2 }
  0xfb   : > { %v669_v7 = vsel %vm668_vm6, %v1138_v59, %v665_v5 }
  0xfc   : > { %v674_v11 = vsel %vm671_vm7, %v673_v6, %v669_v7 }
  0xfd   : > { %v679_v9 = vsub.f32 %v678_v8, %v674_v11 }
  0xff   : > { %vm680_vm8 = vcmp.ge.f32.partialorder %v679_v9, 0.0 }
 0x100   : > { %v681_v12 = vsel %vm680_vm8, 0.0, %v678_v8  ;;  %v1011_v14 = vsel %vm680_vm8, 1.0, %v1254_v13  ;;  %691 = sbr.rel (%p1012_p13) target bundleno = 262 (0x106), region = 40 }
 0x101   : > { %v682_v15 = vadd.f32 %v1140_v10, %v681_v12  ;;  %v686_v17 = vpack.c.bf16 %v1011_v14, %v1011_v14 }
 0x103   : > { %683 = vst [vmem:[#allocation2] sm:$0xff] %v682_v15 }
 0x104   : > { %687 = vst [vmem:[%s212_s11] sm:$0xf] %v686_v17 }
 0x105   : > { %692 = vst [vmem:[#allocation5] sm:$0xff] %v682_v15 }
 0x106 PF: > { %s1014_s12 = sshll.u32 %s1243_s18, 2  ;;  %s707_s10 = sshll.u32 %s212_s11, 4  ;;  %s708_s10 = int_to_ptr.vmem [resolvable:$true] %s707_s10 }
 0x107   : > { %s705_s21 = scalar_lea.hbm %s1724_s3, %s1014_s12  ;;  %s694_s24 = scalar_lea.sflag [#allocation4], %s210_s30 }
 0x108   : > { %s709_s22 = sshll.u32 %s705_s21, 4  ;;  %s1161_s8 = scalar_lea.hbm %s1724_s3, 16  ;;  %s710_s22 = int_to_ptr.hbm [resolvable:$true] %s709_s22 }
 0x109   : > { %s1155_s27 = sshra.s32 %s710_s22, 4  ;;  %s1156_s27 = int_to_ptr.hbm [resolvable:$true] %s1155_s27 }
 0x10a   : > { %s1157_s6 = scalar_lea.hbm %s1156_s27, 4  ;;  %p1162_p5 = scmp.lt.s32.totalorder %s1156_s27, %s1724_s3 }
 0x10b   : > { %p1158_p0 = scmp.ne.s32.totalorder %s1156_s27, %s1157_s6  ;;  %p1163_p6 = scmp.lt.s32.totalorder %s1161_s8, %s1157_s6 }
 0x10d   : > { %p1159_p1 = pnand %p1158_p0, %p1327_p4  ;;  %p1164_p7 = por %p1163_p6, %p1162_p5 }
 0x10f   : > { %p1160_p3 = pneg %p1159_p1 }
 0x111   : > { %p1165_p9 = pnand %p1164_p7, %p1160_p3 }
 0x113   : > { %1168 = shalt.err (!%p1165_p9)
}
 0x114   : > { %1067 = dma.vmem_to_hbm [thread:$0]  (%p1327_p4), %s708_s10, 64, %s710_s22, %s694_s24  }
 0x115   : > { %s723_s11 = sshll.u32 %s1725_s4, 4  ;;  %s1255_s13 = smov [#allocation5]   ;;  %s724_s11 = int_to_ptr.hbm [resolvable:$true] %s723_s11 }
 0x116   : > { %s721_s14 = sshll.u32 %s1255_s13, 4  ;;  %s722_s14 = int_to_ptr.vmem [resolvable:$true] %s721_s14 }
 0x117   : > { %1069 = dma.vmem_to_hbm [thread:$0]  (%p1317_p2), %s722_s14, 128, %s724_s11, [#allocation6]  }
 0x118   : > { %1222 = dma.done.wait (%p1317_p2), [#allocation6], 128  }
 0x119   : > { %1224 = vsyncadd (%p1317_p2), [#allocation6], 4294967168 }
 0x11a PF: > { %p1079_p4 = scmp.ge.s32.totalorder %s1251_s20, 2  ;;  %s740_s26 = sand.u32 1, %s1231_s15  }
 0x11b   : > { %s741_s21 = scalar_lea.sflag [#allocation4], %s740_s26 }
 0x11c   : > { %p1074_p10 = pnand %p1079_p4, %p1334_p8 }
 0x11e   : > { %p1075_p11 = pneg %p1074_p10 }
 0x120   : > { %1226 = dma.done.wait (%p1075_p11), %s741_s21, 64  }
 0x121   : > { %1228 = vsyncadd (%p1075_p11), %s741_s21, 4294967232  ;;  %s19_s20 = sadd.s32 1, %s1251_s20   ;;  %s1729_s15 = smov %s1235_s16 }
 0x122   : > { %p16_p12 = scmp.ge.s32.totalorder %s19_s20, 6   ;;  %s1730_s16 = smov %s1239_s17 }
 0x123   : > { %s1731_s17 = smov %s1340_s29  ;;  %s1732_s18 = smov %s1247_s19 }
 0x124   : > { %s1733_s19 = smov %s1735_s23  ;;  %18 = sbr.rel (!%p16_p12) target bundleno = 5 (0x5), region = 84 }
 0x129   :  { %747 = vsyncpa [#allocation4], 1 }
 0x12a   :  { %749 = vsyncpa [#allocation4 + $0x1], 1 }
 0x12b   :  { %750 = vsyncpa [#allocation6], 1 }

</bundles_post_ra>
